<compile_context>
chip_gen: v7x
topology: tpu7x:2x2x1
jax: 0.10.0
libtpu: 0.0.40
codegen_flags: <defaults>
</compile_context>

<pallas_src>
import functools

import jax
import jax.numpy as jnp
from jax.experimental import pallas as pl
from jax.experimental.pallas import tpu as pltpu


def _round_up(n, m):
    return ((n + m - 1) // m) * m


def _actor_kernel(x_ref, w1_ref, b1_ref, w2_ref, b2_ref, w3_ref, b3_ref, out_ref):
    # fc1 + ReLU: x is DMA'd as f32 and cast to bf16 at the dot (in-kernel cast,
    # no separate wrapper-side XLA pass). bf16 operands -> f32 MXU accumulate,
    # f32 bias/ReLU epilogue.
    h1 = jnp.dot(x_ref[...].astype(jnp.bfloat16), w1_ref[...],
                 preferred_element_type=jnp.float32)
    h1 = jnp.maximum(h1 + b1_ref[...], 0.0)
    # fc2 + ReLU
    h2 = jnp.dot(h1.astype(jnp.bfloat16), w2_ref[...],
                 preferred_element_type=jnp.float32)
    h2 = jnp.maximum(h2 + b2_ref[...], 0.0)
    # fc3 + tanh. Output slab is lane-dense (128-wide); padded w3/b3 columns are
    # zero so the padded lanes hold tanh(0)=0 and the wrapper slices them away.
    h3 = jnp.dot(h2.astype(jnp.bfloat16), w3_ref[...],
                 preferred_element_type=jnp.float32)
    out_ref[...] = jnp.tanh(h3 + b3_ref[...]).astype(out_ref.dtype)


@functools.partial(jax.jit, static_argnames=("tile_b", "action_size"))
def _actor_forward_impl(x, w1, b1, w2, b2, w3p, b3p, *, tile_b, action_size):
    B, S = x.shape
    H1 = w1.shape[1]
    H2 = w2.shape[1]
    a_pad = w3p.shape[1]

    b_pad = pl.cdiv(B, tile_b) * tile_b
    x_p = x if b_pad == B else jnp.pad(x, ((0, b_pad - B), (0, 0)))

    out_padded = pl.pallas_call(
        _actor_kernel,
        out_shape=jax.ShapeDtypeStruct((b_pad, a_pad), jnp.float32),
        grid_spec=pltpu.PrefetchScalarGridSpec(
            num_scalar_prefetch=0,
            grid=(b_pad // tile_b,),
            in_specs=[
                # Activations: tiled over the batch grid axis, f32 in HBM.
                pl.BlockSpec((tile_b, S), lambda i: (i, 0)),
                # Weights / biases: constant index_map -> fetched once, VMEM-resident.
                pl.BlockSpec((S, H1), lambda i: (0, 0)),
                pl.BlockSpec((1, H1), lambda i: (0, 0)),
                pl.BlockSpec((H1, H2), lambda i: (0, 0)),
                pl.BlockSpec((1, H2), lambda i: (0, 0)),
                pl.BlockSpec((H2, a_pad), lambda i: (0, 0)),
                pl.BlockSpec((1, a_pad), lambda i: (0, 0)),
            ],
            out_specs=pl.BlockSpec((tile_b, a_pad), lambda i: (i, 0)),
        ),
        compiler_params=pltpu.CompilerParams(
            # Independent batch tiles -> megacore / v7x dual-TC sharding.
            dimension_semantics=("parallel",),
        ),
    )(x_p, w1, b1, w2, b2, w3p, b3p)

    # TODO(synk): for very large B, an unpadded (masked-store) or bf16 output slab
    # would trim the 32x write amplification of the 128-wide f32 pad.
    return out_padded[:B, :action_size]


def actor_forward(x, prepared_params, *, tile_b_max=512):
    """Thin non-jit wrapper: pick the batch tile adaptively, call the jitted impl."""
    B = x.shape[0]
    b8 = _round_up(max(B, 8), 8)
    if b8 <= tile_b_max:
        # Small/modest batch: size the tile to the batch (no wasted rows), but keep
        # >=2 grid steps once the batch is big enough so v7x's two TCs both work.
        tile_b = _round_up((b8 + 1) // 2, 8) if b8 >= 256 else b8
    else:
        # Large batch: few, fat tiles to amortize per-step overhead on single-TC
        # v5e/v6e while still giving v7x multiple parallel steps.
        tile_b = tile_b_max
    w1, b1, w2, b2, w3p, b3p, action_size = prepared_params
    return _actor_forward_impl(x, w1, b1, w2, b2, w3p, b3p,
                               tile_b=tile_b, action_size=action_size)


def prepare_actor_params(w1, b1, w2, b2, w3, b3):
    """One-time parameter prep, hoisted out of the forward hot path.

    Returns bf16 matmul weights, f32 biases, and the fc3 weight/bias padded to a
    lane-dense 128-wide slab, plus the true action width for slicing.
    """
    A = w3.shape[1]
    a_pad = _round_up(A, 128)
    w3p = jnp.pad(w3, ((0, 0), (0, a_pad - A))).astype(jnp.bfloat16)
    b3p = jnp.pad(b3, ((0, 0), (0, a_pad - A))).astype(jnp.float32)
    return (w1.astype(jnp.bfloat16), b1.astype(jnp.float32),
            w2.astype(jnp.bfloat16), b2.astype(jnp.float32),
            w3p, b3p, A)


def init_actor_params(key, state_size, action_size,
                      hidden_node1=64 * 2 * 2, hidden_node2=32 * 2 * 2):
    """Deterministic parameter init mirroring the PyTorch module (f32 masters).

    NOTE: hidden_init in the reference uses weight.size()[0] == out_features
    (a quirk of the original code); we replicate that bound exactly.
    Weights are returned as [in, out] (transposed vs. PyTorch).
    """
    ks = jax.random.split(key, 6)

    def uniform(k, shape, lim):
        return jax.random.uniform(k, shape, jnp.float32, -lim, lim)

    # fc1: PyTorch weight shape [hidden1, state] -> lim = 1/sqrt(hidden1)
    lim1 = 1.0 / jnp.sqrt(jnp.float32(hidden_node1))
    w1 = uniform(ks[0], (state_size, hidden_node1), lim1)          # [in, out]
    b1 = uniform(ks[1], (1, hidden_node1), 1.0 / jnp.sqrt(jnp.float32(state_size)))

    # fc2: lim = 1/sqrt(hidden2)
    lim2 = 1.0 / jnp.sqrt(jnp.float32(hidden_node2))
    w2 = uniform(ks[2], (hidden_node1, hidden_node2), lim2)
    b2 = uniform(ks[3], (1, hidden_node2), 1.0 / jnp.sqrt(jnp.float32(hidden_node1)))

    # fc3: uniform(-0.003, 0.003)
    w3 = uniform(ks[4], (hidden_node2, action_size), 0.003)
    b3 = uniform(ks[5], (1, action_size), 1.0 / jnp.sqrt(jnp.float32(hidden_node2)))

    return w1, b1, w2, b2, w3, b3


if __name__ == "__main__":
    key = jax.random.PRNGKey(0)
    k_param, k_x = jax.random.split(key)

    batch = 64
    state_size = 32
    action_size = 4

    master = init_actor_params(k_param, state_size, action_size)
    prepared = prepare_actor_params(*master)          # one-time prep, off hot path
    x = jax.random.normal(k_x, (batch, state_size), jnp.float32)

    out = jax.block_until_ready(actor_forward(x, prepared))
    assert out.shape == (batch, action_size)

    # Reference 1: identical bf16-matmul / f32-epilogue math path (tight tolerance).
    w1, b1, w2, b2, w3, b3 = master
    xb = x.astype(jnp.bfloat16)
    h1 = jnp.maximum(
        jnp.dot(xb, w1.astype(jnp.bfloat16), preferred_element_type=jnp.float32) + b1, 0.0)
    h2 = jnp.maximum(
        jnp.dot(h1.astype(jnp.bfloat16), w2.astype(jnp.bfloat16),
                preferred_element_type=jnp.float32) + b2, 0.0)
    ref_bf16 = jnp.tanh(
        jnp.dot(h2.astype(jnp.bfloat16), w3.astype(jnp.bfloat16),
                preferred_element_type=jnp.float32) + b3)
    assert jnp.allclose(out, ref_bf16, atol=2e-3, rtol=2e-3)

    # Reference 2: pure f32 semantics of the original module (loose tolerance,
    # accounts for bf16 matmul operands).
    ref_f32 = jnp.tanh(
        jnp.maximum(jnp.maximum(x @ w1 + b1, 0.0) @ w2 + b2, 0.0) @ w3 + b3)
    assert jnp.allclose(out, ref_f32, atol=3e-2, rtol=3e-2)

    # Exercise the tiny-batch adaptive-tile path (tile sized to 8 rows, no 128-row pad).
    out_small = jax.block_until_ready(actor_forward(x[:8], prepared))
    assert out_small.shape == (8, action_size)
    assert jnp.allclose(out_small, ref_bf16[:8], atol=2e-3, rtol=2e-3)

    print("KERNEL_OK")
</pallas_src>

<mosaic_0001>
module attributes {stable_mosaic.version = 11 : i64} {
  func.func @_actor_kernel(%arg0: i32, %arg1: memref<64x32xf32, #tpu.memory_space<vmem>>, %arg2: memref<32x256xbf16, #tpu.memory_space<vmem>>, %arg3: memref<1x256xf32, #tpu.memory_space<vmem>>, %arg4: memref<256x128xbf16, #tpu.memory_space<vmem>>, %arg5: memref<1x128xf32, #tpu.memory_space<vmem>>, %arg6: memref<128x128xbf16, #tpu.memory_space<vmem>>, %arg7: memref<1x128xf32, #tpu.memory_space<vmem>>, %arg8: memref<64x128xf32, #tpu.memory_space<vmem>>) attributes {dimension_semantics = [#tpu.dimension_semantics<parallel>], iteration_bounds = array<i64: 1>, scalar_prefetch = 0 : i64, scratch_operands = 0 : i64, tpu.core_type = #tpu.core_type<tc>, window_params = [{transform_indices = @transform_0, window_bounds = array<i64: 64, 32>}, {pipeline_mode = #tpu.pipeline_mode<synchronous>, transform_indices = @transform_1, window_bounds = array<i64: 32, 256>}, {pipeline_mode = #tpu.pipeline_mode<synchronous>, transform_indices = @transform_2, window_bounds = array<i64: 1, 256>}, {pipeline_mode = #tpu.pipeline_mode<synchronous>, transform_indices = @transform_3, window_bounds = array<i64: 256, 128>}, {pipeline_mode = #tpu.pipeline_mode<synchronous>, transform_indices = @transform_4, window_bounds = array<i64: 1, 128>}, {pipeline_mode = #tpu.pipeline_mode<synchronous>, transform_indices = @transform_5, window_bounds = array<i64: 128, 128>}, {pipeline_mode = #tpu.pipeline_mode<synchronous>, transform_indices = @transform_6, window_bounds = array<i64: 1, 128>}, {transform_indices = @transform_7, window_bounds = array<i64: 64, 128>}]} {
    %c0 = arith.constant 0 : index
    %c0_0 = arith.constant 0 : index
    %0 = vector.load %arg1[%c0, %c0_0] : memref<64x32xf32, #tpu.memory_space<vmem>>, vector<64x32xf32>
    %1 = arith.truncf %0 : vector<64x32xf32> to vector<64x32xbf16>
    %c0_1 = arith.constant 0 : index
    %c0_2 = arith.constant 0 : index
    %2 = vector.load %arg2[%c0_1, %c0_2] : memref<32x256xbf16, #tpu.memory_space<vmem>>, vector<32x256xbf16>
    %cst = arith.constant dense<0.000000e+00> : vector<64x256xf32>
    %3 = tpu.matmul %1, %2, %cst {dimension_numbers = #tpu.dot_dimension_numbers<[1], [0], [0], [1], [0, 0, 1, 1], [], []>} : vector<64x32xbf16>, vector<32x256xbf16>, vector<64x256xf32> -> vector<64x256xf32>
    %c0_3 = arith.constant 0 : index
    %c0_4 = arith.constant 0 : index
    %4 = vector.load %arg3[%c0_3, %c0_4] : memref<1x256xf32, #tpu.memory_space<vmem>>, vector<1x256xf32>
    %5 = vector.broadcast %4 : vector<1x256xf32> to vector<64x256xf32>
    %6 = arith.addf %3, %5 : vector<64x256xf32>
    %cst_5 = arith.constant 0.000000e+00 : f32
    %7 = vector.broadcast %cst_5 : f32 to vector<64x256xf32>
    %8 = arith.maximumf %6, %7 : vector<64x256xf32>
    %9 = arith.truncf %8 : vector<64x256xf32> to vector<64x256xbf16>
    %c0_6 = arith.constant 0 : index
    %c0_7 = arith.constant 0 : index
    %10 = vector.load %arg4[%c0_6, %c0_7] : memref<256x128xbf16, #tpu.memory_space<vmem>>, vector<256x128xbf16>
    %cst_8 = arith.constant dense<0.000000e+00> : vector<64x128xf32>
    %11 = tpu.matmul %9, %10, %cst_8 {dimension_numbers = #tpu.dot_dimension_numbers<[1], [0], [0], [1], [0, 0, 1, 1], [], []>} : vector<64x256xbf16>, vector<256x128xbf16>, vector<64x128xf32> -> vector<64x128xf32>
    %c0_9 = arith.constant 0 : index
    %c0_10 = arith.constant 0 : index
    %12 = vector.load %arg5[%c0_9, %c0_10] : memref<1x128xf32, #tpu.memory_space<vmem>>, vector<1x128xf32>
    %13 = vector.broadcast %12 : vector<1x128xf32> to vector<64x128xf32>
    %14 = arith.addf %11, %13 : vector<64x128xf32>
    %cst_11 = arith.constant 0.000000e+00 : f32
    %15 = vector.broadcast %cst_11 : f32 to vector<64x128xf32>
    %16 = arith.maximumf %14, %15 : vector<64x128xf32>
    %17 = arith.truncf %16 : vector<64x128xf32> to vector<64x128xbf16>
    %c0_12 = arith.constant 0 : index
    %c0_13 = arith.constant 0 : index
    %18 = vector.load %arg6[%c0_12, %c0_13] : memref<128x128xbf16, #tpu.memory_space<vmem>>, vector<128x128xbf16>
    %cst_14 = arith.constant dense<0.000000e+00> : vector<64x128xf32>
    %19 = tpu.matmul %17, %18, %cst_14 {dimension_numbers = #tpu.dot_dimension_numbers<[1], [0], [0], [1], [0, 0, 1, 1], [], []>} : vector<64x128xbf16>, vector<128x128xbf16>, vector<64x128xf32> -> vector<64x128xf32>
    %c0_15 = arith.constant 0 : index
    %c0_16 = arith.constant 0 : index
    %20 = vector.load %arg7[%c0_15, %c0_16] : memref<1x128xf32, #tpu.memory_space<vmem>>, vector<1x128xf32>
    %21 = vector.broadcast %20 : vector<1x128xf32> to vector<64x128xf32>
    %22 = arith.addf %19, %21 : vector<64x128xf32>
    %23 = math.tanh %22 : vector<64x128xf32>
    %c0_17 = arith.constant 0 : index
    %c0_18 = arith.constant 0 : index
    %24 = vector.load %arg8[%c0_17, %c0_18] : memref<64x128xf32, #tpu.memory_space<vmem>>, vector<64x128xf32>
    tpu.vector_store %arg8[%c0_17, %c0_18], %23 {strides = array<i32>} : memref<64x128xf32, #tpu.memory_space<vmem>>, vector<64x128xf32>,
    return
  }
  func.func @transform_0(%arg0: i32) -> (i32, i32) {
    %c0_i32 = arith.constant 0 : i32
    %c0_i32_0 = arith.constant 0 : i32
    return %arg0, %c0_i32 : i32, i32
  }
  func.func @transform_1(%arg0: i32) -> (i32, i32) {
    %c0_i32 = arith.constant 0 : i32
    %c0_i32_0 = arith.constant 0 : i32
    %c0_i32_1 = arith.constant 0 : i32
    return %c0_i32, %c0_i32_0 : i32, i32
  }
  func.func @transform_2(%arg0: i32) -> (i32, i32) {
    %c0_i32 = arith.constant 0 : i32
    %c0_i32_0 = arith.constant 0 : i32
    %c0_i32_1 = arith.constant 0 : i32
    return %c0_i32, %c0_i32_0 : i32, i32
  }
  func.func @transform_3(%arg0: i32) -> (i32, i32) {
    %c0_i32 = arith.constant 0 : i32
    %c0_i32_0 = arith.constant 0 : i32
    %c0_i32_1 = arith.constant 0 : i32
    return %c0_i32, %c0_i32_0 : i32, i32
  }
  func.func @transform_4(%arg0: i32) -> (i32, i32) {
    %c0_i32 = arith.constant 0 : i32
    %c0_i32_0 = arith.constant 0 : i32
    %c0_i32_1 = arith.constant 0 : i32
    return %c0_i32, %c0_i32_0 : i32, i32
  }
  func.func @transform_5(%arg0: i32) -> (i32, i32) {
    %c0_i32 = arith.constant 0 : i32
    %c0_i32_0 = arith.constant 0 : i32
    %c0_i32_1 = arith.constant 0 : i32
    return %c0_i32, %c0_i32_0 : i32, i32
  }
  func.func @transform_6(%arg0: i32) -> (i32, i32) {
    %c0_i32 = arith.constant 0 : i32
    %c0_i32_0 = arith.constant 0 : i32
    %c0_i32_1 = arith.constant 0 : i32
    return %c0_i32, %c0_i32_0 : i32, i32
  }
  func.func @transform_7(%arg0: i32) -> (i32, i32) {
    %c0_i32 = arith.constant 0 : i32
    %c0_i32_0 = arith.constant 0 : i32
    return %arg0, %c0_i32 : i32, i32
  }
}

</mosaic_0001>

<bundles_post_ra>
// kernel: _actor_forward_impl.1
= control target key start
LH: loop header
LB: loop body
LE: loop exit
PB: predicated region body
PF: predicated region fallthrough
CT: control target
= control target key end

     0   :  { %12 = vsyncpa [#allocation3], 0  ;;  %s752_s24 = smov [#allocation2]   ;;  %s905_s0 = inlined_call_operand.vmem [shape: f32[64,32], index: 0, kind: input, shape index: {}]   ;;  %s906_s1 = inlined_call_operand.vmem [shape: bf16[32,256], index: 1, kind: input, shape index: {}]   ;;  %s907_s2 = inlined_call_operand.vmem [shape: f32[1,256], index: 2, kind: input, shape index: {}]   ;;  %s908_s3 = inlined_call_operand.hbm [shape: bf16[256,128], index: 3, kind: input, shape index: {}]   ;;  %s909_s4 = inlined_call_operand.vmem [shape: f32[1,128], index: 4, kind: input, shape index: {}]   ;;  %s910_s5 = inlined_call_operand.vmem [shape: bf16[128,128], index: 5, kind: input, shape index: {}]   ;;  %s911_s6 = inlined_call_operand.vmem [shape: f32[1,128], index: 6, kind: input, shape index: {}]   ;;  %s912_s7 = inlined_call_operand.vmem [shape: f32[64,128], index: 7, kind: output, shape index: {}]  }
   0x1   :  { %s24_s25 = sshll.u32 %s752_s24, 4  ;;  %s728_s28 = scalar_lea.hbm %s908_s3, 2048  ;;  %s25_s25 = int_to_ptr.vmem [resolvable:$true] %s24_s25 }
   0x2   :  { %p729_p0 = scmp.ne.s32.totalorder %s908_s3, %s728_s28  ;;  %p732_p1 = scmp.lt.u32.totalorder %s728_s28, %s908_s3 }
   0x4   :  { %p734_p2 = pnand %p732_p1, %p729_p0 }
   0x6   :  { %737 = shalt.err (!%p734_p2)
}
   0x7   :  { %s738_s10 = scalar_lea.vmem %s25_s25, 2048  ;;  %p743_p4 = scmp.lt.s32.totalorder %s25_s25, %s25_s25 }
   0x8   :  { %p739_p3 = scmp.ne.s32.totalorder %s25_s25, %s738_s10  ;;  %p744_p5 = scmp.lt.s32.totalorder %s738_s10, %s738_s10 }
   0xa   :  { %p745_p6 = por %p744_p5, %p743_p4 }
   0xc   :  { %p746_p7 = pnand %p745_p6, %p739_p3 }
   0xe   :  { %749 = shalt.err (!%p746_p7)
}
   0xf   :  { %s753_s11 = smov 64   ;;  %s754_s12 = smov 4  }
  0x10   :  { %30 = dma.hbm_to_vmem [thread:$0]  %s908_s3, 2048, %s25_s25, [#allocation3], %s753_s11, %s753_s11, %s754_s12  }
  0x11   :  { %750 = dma.done.wait [#allocation3], 2048  }
  0x12   :  { %751 = vsyncadd [#allocation3], 4294965248  ;;  %v755_v0 = vmov 0   ;;  %v682_v1 = vld [vmem:[%s906_s1 + $0x4] ss:$8 sps:$4 sm:$0xff]   ;;  %vm89_vm0 = vcmask 261120   ;;  %v59_v36 = vlaneseq }
  0x13   :  { %134 = vmatprep.mubr.bf16.mxu0 %v755_v0  ;;  %v684_v2 = vld [vmem:[%s906_s1] ss:$8 sps:$4 sm:$0xff]   ;;  %102 = vmatprep.subr.bf16.mxu0 %v682_v1  ;;  %v685_v3 = vld [vmem:[%s906_s1 + $0x14] ss:$8 sps:$4 sm:$0xff]   ;;  %v687_v4 = vld [vmem:[%s906_s1 + $0x10] ss:$8 sps:$4 sm:$0xff]  }
  0x14   :  { %103 = vmatpush1.bf16.msra.mxu0 %v684_v2  ;;  %v41_v5 = vld [vmem:[%s905_s0] sm:$0xff]  ;;  %v42_v6 = vld [vmem:[%s905_s0 + $0x8] sm:$0xff]  ;;  %v43_v11 = vld [vmem:[%s905_s0 + $0x10] sm:$0xff]  ;;  %v60_v37 = vshrl.u32 %v59_v36, 7 }
  0x15   :  { %104 = vmatprep.subr.bf16.mxu0 %v685_v3  ;;  %v49_v7 = vpack.c.bf16 %v42_v6, %v41_v5  ;;  %v688_v8 = vld [vmem:[#allocation2 + $0x40] sm:$0xff]   ;;  %v690_v10 = vld [vmem:[#allocation2 + $0x48] sm:$0xff]   ;;  %v692_v13 = vld [vmem:[#allocation2 + $0x50] sm:$0xff]  }
  0x16   :  { %v689_v9 = vld [vmem:[#allocation2] sm:$0xff]   ;;  %602 = vmatprep.subr.bf16.mxu1 %v688_v8  ;;  %v691_v12 = vld [vmem:[#allocation2 + $0x8] sm:$0xff]   ;;  %v44_v14 = vld [vmem:[%s905_s0 + $0x18] sm:$0xff]  ;;  %v61_v38 = vsub.s32 0, %v60_v37  ;;  %v65_v40 = vsub.s32 1, %v60_v37 }
  0x17   :  { %603 = vmatpush3.bf16.msra.mxu1 %v689_v9  ;;  %v693_v15 = vld [vmem:[#allocation2 + $0x10] sm:$0xff]   ;;  %v50_v16 = vpack.c.bf16 %v44_v14, %v43_v11  ;;  %v694_v17 = vld [vmem:[#allocation2 + $0x58] sm:$0xff]   ;;  %v696_v19 = vld [vmem:[#allocation2 + $0x60] sm:$0xff]  }
  0x18   :  { %105 = vmatpush1.bf16.msra.mxu0 %v687_v4  ;;  %604 = vmatprep.subr.bf16.mxu1 %v690_v10  ;;  %v695_v18 = vld [vmem:[#allocation2 + $0x18] sm:$0xff]   ;;  %v45_v20 = vld [vmem:[%s905_s0 + $0x20] sm:$0xff]  ;;  %v46_v21 = vld [vmem:[%s905_s0 + $0x28] sm:$0xff] }
  0x19   :  { %v697_v22 = vld [vmem:[#allocation2 + $0x20] sm:$0xff]   ;;  %v698_v23 = vld [vmem:[#allocation2 + $0x68] sm:$0xff]   ;;  %v51_v24 = vpack.c.bf16 %v46_v21, %v45_v20  ;;  %v47_v25 = vld [vmem:[%s905_s0 + $0x30] sm:$0xff] }
  0x1a   :  { %v48_v26 = vld [vmem:[%s905_s0 + $0x38] sm:$0xff]  ;;  %v699_v28 = vld [vmem:[#allocation2 + $0x28] sm:$0xff]   ;;  %v700_v29 = vld [vmem:[#allocation2 + $0x70] sm:$0xff]  }
  0x1b   :  { %572 = vmatmul.mubr.msk.bf16.vlgmr.msra.gmra.mrb[0].mxu0 %vm89_vm0, %v49_v7  ;;  %605 = vmatpush3.bf16.msra.mxu1 %v691_v12  ;;  %v52_v27 = vpack.c.bf16 %v48_v26, %v47_v25  ;;  %v701_v30 = vld [vmem:[#allocation2 + $0x30] sm:$0xff]   ;;  %v702_v31 = vld [vmem:[#allocation2 + $0x78] sm:$0xff]   ;;  %v704_v33 = vld [vmem:[%s910_s5] sm:$0xff]  }
  0x1c   :  { %144 = vmatprep.mubr.bf16.mxu0 %v755_v0  ;;  %606 = vmatprep.subr.bf16.mxu1 %v692_v13  ;;  %v703_v32 = vld [vmem:[#allocation2 + $0x38] sm:$0xff]   ;;  %v705_v34 = vld [vmem:[%s910_s5 + $0x8] sm:$0xff]   ;;  %v706_v35 = vld [vmem:[%s910_s5 + $0x10] sm:$0xff]  }
  0x1d   :  { %654 = vmatprep.subr.bf16.mxu0 %v704_v33  ;;  %v57_v39 = vld [vmem:[%s907_s2] sm:$0x3]  ;;  %v709_v37 = vld [vmem:[%s910_s5 + $0x28] sm:$0xff]  }
  0x1e   :  { %655 = vmatpush3.bf16.msra.mxu0 %v704_v33  ;;  %v62_v41 = vrot.slane %v57_v39, %v61_v38  ;;  %v66_v42 = vrot.slane %v57_v39, %v65_v40  ;;  %v708_v36 = vld [vmem:[%s910_s5 + $0x20] sm:$0xff]   ;;  %v710_v38 = vld [vmem:[%s910_s5 + $0x30] sm:$0xff]   ;;  %v711_v39 = vld [vmem:[%s910_s5 + $0x38] sm:$0xff]  }
  0x1f   :  { %607 = vmatpush3.bf16.msra.mxu1 %v693_v15  ;;  %656 = vmatprep.subr.bf16.mxu0 %v705_v34 }
  0x20   :  { %608 = vmatprep.subr.bf16.mxu1 %v694_v17 }
  0x22   :  { %657 = vmatpush3.bf16.msra.mxu0 %v705_v34 }
  0x23   :  { %573 = vmatmul.mubr.msk.bf16.gmra.mrb[4].mxu0 %vm89_vm0, %v50_v16  ;;  %609 = vmatpush3.bf16.msra.mxu1 %v695_v18 }
  0x24   :  { %154 = vmatprep.mubr.bf16.mxu0 %v755_v0  ;;  %610 = vmatprep.subr.bf16.mxu1 %v696_v19 }
  0x25   :  { %658 = vmatprep.subr.bf16.mxu0 %v706_v35 }
  0x26   :  { %659 = vmatpush3.bf16.msra.mxu0 %v706_v35  ;;  %v707_v35 = vld [vmem:[%s910_s5 + $0x18] sm:$0xff]  }
  0x27   :  { %611 = vmatpush3.bf16.msra.mxu1 %v697_v22  ;;  %660 = vmatprep.subr.bf16.mxu0 %v707_v35 }
  0x28   :  { %612 = vmatprep.subr.bf16.mxu1 %v698_v23 }
  0x2a   :  { %661 = vmatpush3.bf16.msra.mxu0 %v707_v35 }
  0x2b   :  { %574 = vmatmul.mubr.msk.bf16.gmra.mrb[8].mxu0 %vm89_vm0, %v51_v24  ;;  %613 = vmatpush3.bf16.msra.mxu1 %v699_v28 }
  0x2c   :  { %164 = vmatprep.mubr.bf16.mxu0 %v755_v0  ;;  %614 = vmatprep.subr.bf16.mxu1 %v700_v29 }
  0x2d   :  { %662 = vmatprep.subr.bf16.mxu0 %v708_v36 }
  0x2e   :  { %663 = vmatpush3.bf16.msra.mxu0 %v708_v36 }
  0x2f   :  { %615 = vmatpush3.bf16.msra.mxu1 %v701_v30  ;;  %664 = vmatprep.subr.bf16.mxu0 %v709_v37 }
  0x30   :  { %616 = vmatprep.subr.bf16.mxu1 %v702_v31 }
  0x32   :  { %665 = vmatpush3.bf16.msra.mxu0 %v709_v37 }
  0x33   :  { %575 = vmatmul.mubr.msk.bf16.gmra.mrb[12].mxu0 %vm89_vm0, %v52_v27  ;;  %617 = vmatpush3.bf16.msra.mxu1 %v703_v32 }
  0x34   :  { %666 = vmatprep.subr.bf16.mxu0 %v710_v38 }
  0x36   :  { %667 = vmatpush3.bf16.msra.mxu0 %v710_v38 }
  0x37   :  { %668 = vmatprep.subr.bf16.mxu0 %v711_v39 }
  0x3a   :  { %669 = vmatpush3.bf16.msra.mxu0 %v711_v39 }
  0xee   :  { %v136_v43 = vpop.f32.mrb[0].mxu0 }
  0xef   :  { %v137_v44 = vadd.f32 %v136_v43, %v62_v41  ;;  %v138_v45 = vpop.f32.mrb[1].mxu0 }
  0xf0   :  { %v139_v46 = vadd.f32 %v138_v45, %v66_v42  ;;  %v140_v47 = vpop.f32.mrb[2].mxu0 }
  0xf1   :  { %v141_v48 = vadd.f32 %v140_v47, %v62_v41  ;;  %v142_v49 = vpop.f32.mrb[3].mxu0  ;;  %v175_v51 = vmax.f32 %v137_v44, 0.0 }
  0xf2   :  { %v143_v50 = vadd.f32 %v142_v49, %v66_v42  ;;  %v176_v53 = vmax.f32 %v139_v46, 0.0 }
  0xf3   :  { %v177_v52 = vmax.f32 %v141_v48, 0.0 }
  0xf4   :  { %v178_v54 = vmax.f32 %v143_v50, 0.0 }
  0xf5   :  { %v191_v55 = vpack.c.bf16 %v177_v52, %v175_v51 }
  0xf6   :  { %v146_v56 = vpop.f32.mrb[4].mxu0  ;;  %v192_v57 = vpack.c.bf16 %v178_v54, %v176_v53 }
  0xf7   :  { %v147_v58 = vadd.f32 %v146_v56, %v62_v41  ;;  %v148_v59 = vpop.f32.mrb[5].mxu0 }
  0xf8   :  { %v149_v60 = vadd.f32 %v148_v59, %v66_v42  ;;  %v150_v61 = vpop.f32.mrb[6].mxu0  ;;  %366 = vmatprep.mubr.bf16.mxu1 %v192_v57 }
  0xf9   :  { %v151_v62 = vadd.f32 %v150_v61, %v62_v41  ;;  %v152_v63 = vpop.f32.mrb[7].mxu0  ;;  %367 = vmatmul.mubr.bf16.vlgmr.msra.gmra.mrb[0].mxu1 %v191_v55  ;;  %v179_v1 = vmax.f32 %v147_v58, 0.0 }
  0xfa   :  { %v153_v0 = vadd.f32 %v152_v63, %v66_v42  ;;  %v180_v3 = vmax.f32 %v149_v60, 0.0 }
  0xfb   :  { %v181_v2 = vmax.f32 %v151_v62, 0.0 }
  0xfc   :  { %v182_v4 = vmax.f32 %v153_v0, 0.0 }
  0xfd   :  { %v193_v5 = vpack.c.bf16 %v181_v2, %v179_v1 }
  0xfe   :  { %v194_v6 = vpack.c.bf16 %v182_v4, %v180_v3  ;;  %v156_v7 = vpop.f32.mrb[8].mxu0 }
  0xff   :  { %v157_v8 = vadd.f32 %v156_v7, %v62_v41  ;;  %v158_v9 = vpop.f32.mrb[9].mxu0 }
 0x100   :  { %v159_v10 = vadd.f32 %v158_v9, %v66_v42  ;;  %v160_v11 = vpop.f32.mrb[10].mxu0  ;;  %374 = vmatprep.mubr.bf16.mxu1 %v194_v6 }
 0x101   :  { %v161_v12 = vadd.f32 %v160_v11, %v62_v41  ;;  %v162_v13 = vpop.f32.mrb[11].mxu0  ;;  %375 = vmatmul.mubr.bf16.gmra.mrb[4].mxu1 %v193_v5  ;;  %v183_v15 = vmax.f32 %v157_v8, 0.0 }
 0x102   :  { %v163_v14 = vadd.f32 %v162_v13, %v66_v42  ;;  %v184_v17 = vmax.f32 %v159_v10, 0.0 }
 0x103   :  { %v185_v16 = vmax.f32 %v161_v12, 0.0 }
 0x104   :  { %v186_v18 = vmax.f32 %v163_v14, 0.0 }
 0x105   :  { %v195_v19 = vpack.c.bf16 %v185_v16, %v183_v15 }
 0x106   :  { %v196_v20 = vpack.c.bf16 %v186_v18, %v184_v17  ;;  %v166_v21 = vpop.f32.mrb[12].mxu0 }
 0x107   :  { %v167_v22 = vadd.f32 %v166_v21, %v62_v41  ;;  %v168_v23 = vpop.f32.mrb[13].mxu0  ;;  %v593_v21 = vld [vmem:[%s911_s6] ss:$0 sm:$0xff] }
 0x108   :  { %v169_v24 = vadd.f32 %v168_v23, %v66_v42  ;;  %v170_v25 = vpop.f32.mrb[14].mxu0  ;;  %382 = vmatprep.mubr.bf16.mxu1 %v196_v20 }
 0x109   :  { %v171_v26 = vadd.f32 %v170_v25, %v62_v41  ;;  %v172_v27 = vpop.f32.mrb[15].mxu0  ;;  %383 = vmatmul.mubr.bf16.gmra.mrb[8].mxu1 %v195_v19  ;;  %v187_v29 = vmax.f32 %v167_v22, 0.0  ;;  %v576_v41 = vld [vmem:[%s909_s4] ss:$0 sm:$0xff] }
 0x10a   :  { %v173_v28 = vadd.f32 %v172_v27, %v66_v42  ;;  %v188_v31 = vmax.f32 %v169_v24, 0.0 }
 0x10b   :  { %v189_v30 = vmax.f32 %v171_v26, 0.0 }
 0x10c   :  { %v190_v32 = vmax.f32 %v173_v28, 0.0 }
 0x10d   :  { %v197_v33 = vpack.c.bf16 %v189_v30, %v187_v29 }
 0x10e   :  { %v198_v34 = vpack.c.bf16 %v190_v32, %v188_v31 }
 0x110   :  { %390 = vmatprep.mubr.bf16.mxu1 %v198_v34 }
 0x111   :  { %391 = vmatmul.mubr.bf16.gmra.mrb[12].mxu1 %v197_v33 }
 0x1cc   :  { %v618_v40 = vpop.f32.mrb[0].mxu1 }
 0x1cd   :  { %v619_v42 = vpop.f32.mrb[1].mxu1 }
 0x1ce   :  { %v620_v43 = vadd.f32 %v619_v42, %v618_v40  ;;  %v621_v44 = vpop.f32.mrb[2].mxu1 }
 0x1cf   :  { %v622_v45 = vpop.f32.mrb[3].mxu1 }
 0x1d0   :  { %v369_v46 = vadd.f32 %v620_v43, %v576_v41  ;;  %v623_v47 = vadd.f32 %v622_v45, %v621_v44 }
 0x1d2   :  { %v372_v48 = vadd.f32 %v623_v47, %v576_v41  ;;  %v399_v49 = vmax.f32 %v369_v46, 0.0 }
 0x1d4   :  { %v400_v50 = vmax.f32 %v372_v48, 0.0  ;;  %v624_v51 = vpop.f32.mrb[4].mxu1 }
 0x1d5   :  { %v625_v52 = vpop.f32.mrb[5].mxu1 }
 0x1d6   :  { %v626_v53 = vadd.f32 %v625_v52, %v624_v51  ;;  %v627_v54 = vpop.f32.mrb[6].mxu1  ;;  %v407_v55 = vpack.c.bf16 %v400_v50, %v399_v49 }
 0x1d7   :  { %v628_v56 = vpop.f32.mrb[7].mxu1 }
 0x1d8   :  { %v377_v57 = vadd.f32 %v626_v53, %v576_v41  ;;  %v629_v58 = vadd.f32 %v628_v56, %v627_v54  ;;  %670 = vmatprep.mubr.bf16.mxu0 %v407_v55 }
 0x1da   :  { %v380_v59 = vadd.f32 %v629_v58, %v576_v41  ;;  %v401_v60 = vmax.f32 %v377_v57, 0.0 }
 0x1dc   :  { %v402_v61 = vmax.f32 %v380_v59, 0.0  ;;  %v630_v62 = vpop.f32.mrb[8].mxu1 }
 0x1dd   :  { %v631_v63 = vpop.f32.mrb[9].mxu1 }
 0x1de   :  { %v408_v0 = vpack.c.bf16 %v402_v61, %v401_v60  ;;  %v632_v1 = vadd.f32 %v631_v63, %v630_v62  ;;  %v633_v2 = vpop.f32.mrb[10].mxu1 }
 0x1df   :  { %v634_v3 = vpop.f32.mrb[11].mxu1 }
 0x1e0   :  { %v385_v4 = vadd.f32 %v632_v1, %v576_v41  ;;  %v635_v5 = vadd.f32 %v634_v3, %v633_v2  ;;  %671 = vmatmul.mubr.bf16.vlgmr.msra.gmra.mrb[16].mxu0 %v408_v0 }
 0x1e2   :  { %v388_v6 = vadd.f32 %v635_v5, %v576_v41  ;;  %v403_v7 = vmax.f32 %v385_v4, 0.0 }
 0x1e4   :  { %v404_v8 = vmax.f32 %v388_v6, 0.0  ;;  %v636_v9 = vpop.f32.mrb[12].mxu1 }
 0x1e5   :  { %v637_v10 = vpop.f32.mrb[13].mxu1 }
 0x1e6   :  { %v638_v11 = vadd.f32 %v637_v10, %v636_v9  ;;  %v639_v12 = vpop.f32.mrb[14].mxu1  ;;  %v409_v13 = vpack.c.bf16 %v404_v8, %v403_v7 }
 0x1e7   :  { %v640_v14 = vpop.f32.mrb[15].mxu1 }
 0x1e8   :  { %v393_v15 = vadd.f32 %v638_v11, %v576_v41  ;;  %v641_v16 = vadd.f32 %v640_v14, %v639_v12  ;;  %674 = vmatprep.mubr.bf16.mxu0 %v409_v13 }
 0x1ea   :  { %v396_v17 = vadd.f32 %v641_v16, %v576_v41  ;;  %v405_v18 = vmax.f32 %v393_v15, 0.0 }
 0x1ec   :  { %v406_v19 = vmax.f32 %v396_v17, 0.0 }
 0x1ee   :  { %v410_v20 = vpack.c.bf16 %v406_v19, %v405_v18 }
 0x1f0   :  { %675 = vmatmul.mubr.bf16.gmra.mrb[20].mxu0 %v410_v20 }
 0x2b3   :  { %v672_v22 = vpop.f32.mrb[16].mxu0 }
 0x2b4   :  { %v525_v23 = vadd.f32 %v672_v22, %v593_v21  ;;  %v516_v24 = vpop.f32.mrb[17].mxu0 }
 0x2b5   :  { %v517_v25 = vadd.f32 %v593_v21, %v516_v24  ;;  %v673_v26 = vpop.f32.mrb[18].mxu0 }
 0x2b6   :  { %712 = vtanh.f32 %v525_v23  ;;  %v528_v27 = vadd.f32 %v673_v26, %v593_v21  ;;  %v519_v28 = vpop.f32.mrb[19].mxu0 }
 0x2b7   :  { %714 = vtanh.f32 %v517_v25  ;;  %v520_v29 = vadd.f32 %v593_v21, %v519_v28 }
 0x2b8   :  { %716 = vtanh.f32 %v528_v27 }
 0x2b9   :  { %718 = vtanh.f32 %v520_v29 }
 0x2c0   :  { %v713_v30 = vpop.eup %712 }
 0x2c1   :  { %v715_v31 = vpop.eup %714  ;;  %557 = vst [vmem:[%s912_s7 + $0x10] sm:$0xff] %v713_v30 }
 0x2c2   :  { %v717_v32 = vpop.eup %716  ;;  %555 = vst [vmem:[%s912_s7] sm:$0xff] %v715_v31 }
 0x2c3   :  { %v719_v33 = vpop.eup %718  ;;  %558 = vst [vmem:[%s912_s7 + $0x18] sm:$0xff] %v717_v32  ;;  %v676_v34 = vpop.f32.mrb[20].mxu0 }
 0x2c4   :  { %556 = vst [vmem:[%s912_s7 + $0x8] sm:$0xff] %v719_v33  ;;  %v541_v35 = vadd.f32 %v676_v34, %v593_v21  ;;  %v532_v36 = vpop.f32.mrb[21].mxu0 }
 0x2c5   :  { %v533_v37 = vadd.f32 %v593_v21, %v532_v36  ;;  %v677_v38 = vpop.f32.mrb[22].mxu0 }
 0x2c6   :  { %720 = vtanh.f32 %v541_v35  ;;  %v544_v39 = vadd.f32 %v677_v38, %v593_v21  ;;  %v535_v40 = vpop.f32.mrb[23].mxu0 }
 0x2c7   :  { %722 = vtanh.f32 %v533_v37  ;;  %v536_v41 = vadd.f32 %v593_v21, %v535_v40 }
 0x2c8   :  { %724 = vtanh.f32 %v544_v39 }
 0x2c9   :  { %726 = vtanh.f32 %v536_v41 }
 0x2d0   :  { %v721_v42 = vpop.eup %720 }
 0x2d1   :  { %v723_v43 = vpop.eup %722  ;;  %561 = vst [vmem:[%s912_s7 + $0x30] sm:$0xff] %v721_v42 }
 0x2d2   :  { %v725_v44 = vpop.eup %724  ;;  %559 = vst [vmem:[%s912_s7 + $0x20] sm:$0xff] %v723_v43 }
 0x2d3   :  { %v727_v45 = vpop.eup %726  ;;  %562 = vst [vmem:[%s912_s7 + $0x38] sm:$0xff] %v725_v44 }
 0x2d4   :  { %560 = vst [vmem:[%s912_s7 + $0x28] sm:$0xff] %v727_v45 }
 0x2d5   :  { %567 = vsyncpa [#allocation3], 1 }

</bundles_post_ra>
